<compile_context>
chip_gen: v6e
topology: v6e:2x2x1
jax: 0.10.0
libtpu: 0.0.40
codegen_flags: <defaults>
</compile_context>

<pallas_src>
import functools
import math

import jax
import jax.numpy as jnp
from jax.experimental import pallas as pl
from jax.experimental.pallas import tpu as pltpu


def _round_up(v, m):
    return (v + m - 1) // m * m


def _pick_row_tile(m):
    """Largest row tile in {512,256,128} that still gives >=2 grid steps
    (keeps both v7x TensorCores busy); tiny M falls back to one padded block."""
    for tm in (512, 256, 128):
        if m >= 2 * tm:
            return tm
    return max(8, _round_up(m, 8))


def _vmem_limit_bytes():
    """~half of physical VMEM (64 MiB on v5e/v6e, 32 MiB on v7x); 32 MiB if
    the hardware query is unavailable."""
    try:
        cap = pltpu.get_tpu_info().vmem_capacity_bytes
        return int(min(96 * 2**20, max(32 * 2**20, cap // 2)))
    except Exception:
        return 32 * 2**20


# ---------------------------------------------------------------------------
# Pass 1: 3x3 conv as one lane-dense MXU matmul per row block + BN statistics.
# ---------------------------------------------------------------------------
def conv3x3_stats_kernel(p_ref, w1_ref, c_ref, stats_ref):
    """p_ref : (TM, Kp)   bf16  im2col patches for this row block
       w1_ref: (Kp, C1p)  bf16  im2col-reshaped 3x3 weights
       c_ref : (TM, C1p)  bf16  conv activations
       stats : (1, 2, C1p) f32  per-block per-channel [sum, sum_of_squares]
    """
    acc = jnp.dot(p_ref[...], w1_ref[...], preferred_element_type=jnp.float32)
    c_bf = acc.astype(c_ref.dtype)
    c_ref[...] = c_bf
    # Stats are taken on the *stored* (bf16-rounded) activations so the BN
    # scale/shift derived from them match exactly what pass 2 normalizes.
    cr = c_bf.astype(jnp.float32)
    stats_ref[0, 0:1, :] = jnp.sum(cr, axis=0, keepdims=True)
    stats_ref[0, 1:2, :] = jnp.sum(cr * cr, axis=0, keepdims=True)


# ---------------------------------------------------------------------------
# Pass 2: folded BatchNorm + SiLU + 1x1 conv, lane-dense 128-padded output.
# ---------------------------------------------------------------------------
def bn_silu_conv1x1_kernel(c_ref, scale_ref, shift_ref, w2_ref, b2_ref, o_ref):
    """c_ref : (TM, C1p) bf16    scale/shift : (1, C1p) f32
       w2_ref: (C1p, C2p) bf16   b2_ref : (1, C2p) f32    o_ref: (TM, C2p) bf16
    """
    y = c_ref[...].astype(jnp.float32) * scale_ref[...] + shift_ref[...]
    # SiLU: exp and the approximate reciprocal both ride the (idle) EUP slot.
    y = y * pl.reciprocal(1.0 + jnp.exp(-y), approx=True)
    z = jnp.dot(y.astype(jnp.bfloat16), w2_ref[...],
                preferred_element_type=jnp.float32)
    o_ref[...] = (z + b2_ref[...]).astype(o_ref.dtype)


# ---------------------------------------------------------------------------
# Wrapper
# ---------------------------------------------------------------------------
@functools.partial(jax.jit, static_argnums=(2,))
def detect_forward(x_nchw, params, nc):
    """Pallas-backed equivalent of Detect.forward (PyTorch NCHW input)."""
    w1, gamma, beta, w2, b2 = params
    B, Cin, H, W = x_nchw.shape
    C1 = w1.shape[-1]
    C2 = w2.shape[-1]
    K = 9 * Cin
    C1p = _round_up(C1, 128)           # lane-dense hidden channel dim
    C2p = _round_up(C2, 128)           # lane-dense head output (123 -> 128)
    Kp = _round_up(K, 128)             # lane-dense contraction dim
    eps = 1e-3
    M = B * H * W
    TM = _pick_row_tile(M)
    Mp = _round_up(M, TM)
    n_rb = Mp // TM
    vmem_limit = _vmem_limit_bytes()

    # ---- parameter prep (tiny, one time) ----------------------------------
    w1_mat = jnp.pad(w1.reshape(K, C1),
                     ((0, Kp - K), (0, C1p - C1))).astype(jnp.bfloat16)
    gamma_p = jnp.pad(gamma, (0, C1p - C1)).astype(jnp.float32)
    beta_p = jnp.pad(beta, (0, C1p - C1)).astype(jnp.float32)
    w2_p = jnp.pad(w2, ((0, C1p - C1), (0, C2p - C2))).astype(jnp.bfloat16)
    b2_p = jnp.pad(b2, (0, C2p - C2)).astype(jnp.float32).reshape(1, C2p)

    # ---- lane-friendly bf16 im2col patch slab, built once in XLA ----------
    # Keeps all layout shuffling (NCHW->NHWC, pad, 9 taps) out of the kernel;
    # the kernel then does one (TM,Kp)x(Kp,C1p) bf16 MXU matmul per block.
    x_nhwc = jnp.transpose(x_nchw, (0, 2, 3, 1)).astype(jnp.bfloat16)
    xp = jnp.pad(x_nhwc, ((0, 0), (1, 1), (1, 1), (0, 0)))
    taps = [xp[:, ky:ky + H, kx:kx + W, :]
            for ky in range(3) for kx in range(3)]          # 9 x (B,H,W,Cin)
    patches = jnp.concatenate(taps, axis=-1).reshape(M, K)
    patches = jnp.pad(patches, ((0, Mp - M), (0, Kp - K)))  # zero rows/cols

    # ---- pass 1: conv3x3 + per-block channel statistics -------------------
    cost1 = pl.CostEstimate(
        flops=2 * Mp * Kp * C1p + 3 * Mp * C1p,
        transcendentals=0,
        bytes_accessed=(Mp * Kp * 2 + Kp * C1p * 2 + Mp * C1p * 2
                        + n_rb * 2 * C1p * 4),
    )
    conv_out, stats = pl.pallas_call(
        conv3x3_stats_kernel,
        out_shape=(
            jax.ShapeDtypeStruct((Mp, C1p), jnp.bfloat16),
            jax.ShapeDtypeStruct((n_rb, 2, C1p), jnp.float32),
        ),
        grid=(n_rb,),
        in_specs=[
            pl.BlockSpec((TM, Kp), lambda i: (i, 0)),
            pl.BlockSpec((Kp, C1p), lambda i: (0, 0)),
        ],
        out_specs=(
            pl.BlockSpec((TM, C1p), lambda i: (i, 0)),
            pl.BlockSpec((1, 2, C1p), lambda i: (i, 0, 0)),
        ),
        compiler_params=pltpu.CompilerParams(
            dimension_semantics=("parallel",),
            vmem_limit_bytes=vmem_limit,
        ),
        cost_estimate=cost1,
    )(patches, w1_mat)

    # ---- fold BatchNorm (batch stats, biased variance) into scale/shift ---
    # Zero pad-rows contribute 0 to both sums; divide by the true M.
    sums = jnp.sum(stats, axis=0)                 # (2, C1p)
    mean = sums[0] / M
    var = jnp.maximum(sums[1] / M - mean * mean, 0.0)   # clamp cancellation
    inv = gamma_p * jax.lax.rsqrt(var + eps)
    scale = inv.reshape(1, C1p)
    shift = (beta_p - mean * inv).reshape(1, C1p)

    # ---- pass 2: BN + SiLU + 1x1 conv over flattened (B*H*W) rows ---------
    cost2 = pl.CostEstimate(
        flops=2 * Mp * C1p * C2p + 6 * Mp * C1p,
        transcendentals=Mp * C1p,
        bytes_accessed=(Mp * C1p * 2 + C1p * C2p * 2 + Mp * C2p * 2
                        + 2 * C1p * 4 + C2p * 4),
    )
    out_flat = pl.pallas_call(
        bn_silu_conv1x1_kernel,
        out_shape=jax.ShapeDtypeStruct((Mp, C2p), jnp.bfloat16),
        grid=(n_rb,),
        in_specs=[
            pl.BlockSpec((TM, C1p), lambda i: (i, 0)),
            pl.BlockSpec((1, C1p), lambda i: (0, 0)),
            pl.BlockSpec((1, C1p), lambda i: (0, 0)),
            pl.BlockSpec((C1p, C2p), lambda i: (0, 0)),
            pl.BlockSpec((1, C2p), lambda i: (0, 0)),
        ],
        out_specs=pl.BlockSpec((TM, C2p), lambda i: (i, 0)),
        compiler_params=pltpu.CompilerParams(
            dimension_semantics=("parallel",),
            vmem_limit_bytes=vmem_limit,
        ),
        cost_estimate=cost2,
    )(conv_out, scale, shift, w2_p, b2_p)

    # Drop channel/row padding and match torch layout:
    # (B,H,W,3*(nc+5)) -> (B,3,H,W,nc+5).  A real consumer should accept the
    # lane-dense layout (or fuse this permute) to skip the extra HBM pass.
    out = out_flat[:M, :C2].astype(jnp.float32).reshape(B, H, W, 3, nc + 5)
    return out.transpose(0, 3, 1, 2, 4)


# ---------------------------------------------------------------------------
# Pure-JAX reference (lax.conv) for correctness checking.
# ---------------------------------------------------------------------------
def detect_reference(x_nchw, params, nc):
    w1, gamma, beta, w2, b2 = params
    B, Cin, H, W = x_nchw.shape
    C1 = w1.shape[-1]
    C2 = w2.shape[-1]

    w1_oihw = jnp.transpose(w1, (3, 2, 0, 1))   # HWIO -> OIHW
    c = jax.lax.conv_general_dilated(
        x_nchw.astype(jnp.float32), w1_oihw, (1, 1), ((1, 1), (1, 1)),
        dimension_numbers=("NCHW", "OIHW", "NCHW"))
    mean = c.mean(axis=(0, 2, 3), keepdims=True)
    var = ((c - mean) ** 2).mean(axis=(0, 2, 3), keepdims=True)
    y = (c - mean) / jnp.sqrt(var + 1e-3)
    y = y * gamma.reshape(1, -1, 1, 1) + beta.reshape(1, -1, 1, 1)
    y = y * jax.nn.sigmoid(y)
    w2_oihw = jnp.transpose(w2, (1, 0)).reshape(C2, C1, 1, 1)
    z = jax.lax.conv_general_dilated(
        y, w2_oihw, (1, 1), ((0, 0), (0, 0)),
        dimension_numbers=("NCHW", "OIHW", "NCHW"))
    z = z + b2.reshape(1, -1, 1, 1)
    return z.reshape(B, 3, nc + 5, H, W).transpose(0, 1, 3, 4, 2)


def make_params(key, in_channels, nc):
    """Deterministic synthetic parameters with the module's __init__ shapes."""
    c1 = in_channels * 2          # Conv(in, 2*in, 3, 1)  -- no bias (bn_act)
    c2 = 3 * (nc + 5)             # Conv(2*in, 3*(nc+5), 1, 1, bn_act=False)
    k1, k2, k3, k4, k5 = jax.random.split(key, 5)
    # torch Conv2d weight (Cout, Cin, kh, kw) stored here as HWIO
    w1 = (jax.random.normal(k1, (3, 3, in_channels, c1), jnp.float32)
          / math.sqrt(in_channels * 9))
    gamma = 1.0 + 0.1 * jax.random.normal(k2, (c1,), jnp.float32)
    beta = 0.1 * jax.random.normal(k3, (c1,), jnp.float32)
    w2 = jax.random.normal(k4, (c1, c2), jnp.float32) / math.sqrt(c1)
    b2 = 0.1 * jax.random.normal(k5, (c2,), jnp.float32)
    return (w1, gamma, beta, w2, b2)


if __name__ == "__main__":
    B, Cin, H, W = 2, 4, 16, 16
    nc = 36

    key = jax.random.PRNGKey(0)
    kx, kp = jax.random.split(key)
    x = jax.random.normal(kx, (B, Cin, H, W), jnp.float32)   # NCHW like torch
    params = make_params(kp, Cin, nc)

    out = jax.block_until_ready(detect_forward(x, params, nc))
    assert out.shape == (B, 3, H, W, nc + 5), out.shape

    ref = jax.block_until_ready(detect_reference(x, params, nc))
    # Matmul inputs/outputs are bf16; compare against the f32 reference with a
    # bf16-appropriate tolerance.
    max_err = float(jnp.max(jnp.abs(out - ref)))
    assert jnp.allclose(out, ref, rtol=4e-2, atol=4e-2), max_err

    print("KERNEL_OK")
</pallas_src>

<mosaic_0001>
module attributes {stable_mosaic.version = 11 : i64} {
  func.func @conv3x3_stats_kernel(%arg0: i32, %arg1: memref<256x128xbf16, #tpu.memory_space<vmem>>, %arg2: memref<128x128xbf16, #tpu.memory_space<vmem>>, %arg3: memref<256x128xbf16, #tpu.memory_space<vmem>>, %arg4: memref<1x2x128xf32, #tpu.memory_space<vmem>>) attributes {dimension_semantics = [#tpu.dimension_semantics<parallel>], iteration_bounds = array<i64: 2>, scalar_prefetch = 0 : i64, scratch_operands = 0 : i64, tpu.core_type = #tpu.core_type<tc>, window_params = [{transform_indices = @transform_0, window_bounds = array<i64: 256, 128>}, {pipeline_mode = #tpu.pipeline_mode<synchronous>, transform_indices = @transform_1, window_bounds = array<i64: 128, 128>}, {transform_indices = @transform_2, window_bounds = array<i64: 256, 128>}, {transform_indices = @transform_3, window_bounds = array<i64: 1, 2, 128>}]} {
    %c0 = arith.constant 0 : index
    %c0_0 = arith.constant 0 : index
    %0 = vector.load %arg1[%c0, %c0_0] : memref<256x128xbf16, #tpu.memory_space<vmem>>, vector<256x128xbf16>
    %c0_1 = arith.constant 0 : index
    %c0_2 = arith.constant 0 : index
    %1 = vector.load %arg2[%c0_1, %c0_2] : memref<128x128xbf16, #tpu.memory_space<vmem>>, vector<128x128xbf16>
    %cst = arith.constant dense<0.000000e+00> : vector<256x128xf32>
    %2 = tpu.matmul %0, %1, %cst {dimension_numbers = #tpu.dot_dimension_numbers<[1], [0], [0], [1], [0, 0, 1, 1], [], []>} : vector<256x128xbf16>, vector<128x128xbf16>, vector<256x128xf32> -> vector<256x128xf32>
    %3 = arith.truncf %2 : vector<256x128xf32> to vector<256x128xbf16>
    %c0_3 = arith.constant 0 : index
    %c0_4 = arith.constant 0 : index
    %4 = vector.load %arg3[%c0_3, %c0_4] : memref<256x128xbf16, #tpu.memory_space<vmem>>, vector<256x128xbf16>
    tpu.vector_store %arg3[%c0_3, %c0_4], %3 {strides = array<i32>} : memref<256x128xbf16, #tpu.memory_space<vmem>>, vector<256x128xbf16>,
    %5 = arith.extf %3 : vector<256x128xbf16> to vector<256x128xf32>
    %cst_5 = arith.constant dense<0.000000e+00> : vector<128xf32>
    %6 = vector.multi_reduction <add>, %5, %cst_5 [0] : vector<256x128xf32> to vector<128xf32>
    %7 = vector.shape_cast %6 : vector<128xf32> to vector<1x128xf32>
    %c0_6 = arith.constant 0 : index
    %c0_7 = arith.constant 0 : index
    %c0_8 = arith.constant 0 : index
    %8 = vector.load %arg4[%c0_6, %c0_7, %c0_8] : memref<1x2x128xf32, #tpu.memory_space<vmem>>, vector<1x1x128xf32>
    %9 = vector.shape_cast %8 : vector<1x1x128xf32> to vector<1x128xf32>
    %10 = vector.shape_cast %7 : vector<1x128xf32> to vector<1x1x128xf32>
    tpu.vector_store %arg4[%c0_6, %c0_7, %c0_8], %10 {strides = array<i32>} : memref<1x2x128xf32, #tpu.memory_space<vmem>>, vector<1x1x128xf32>,
    %11 = arith.mulf %5, %5 : vector<256x128xf32>
    %cst_9 = arith.constant dense<0.000000e+00> : vector<128xf32>
    %12 = vector.multi_reduction <add>, %11, %cst_9 [0] : vector<256x128xf32> to vector<128xf32>
    %13 = vector.shape_cast %12 : vector<128xf32> to vector<1x128xf32>
    %c0_10 = arith.constant 0 : index
    %c1 = arith.constant 1 : index
    %c0_11 = arith.constant 0 : index
    %14 = vector.load %arg4[%c0_10, %c1, %c0_11] : memref<1x2x128xf32, #tpu.memory_space<vmem>>, vector<1x1x128xf32>
    %15 = vector.shape_cast %14 : vector<1x1x128xf32> to vector<1x128xf32>
    %16 = vector.shape_cast %13 : vector<1x128xf32> to vector<1x1x128xf32>
    tpu.vector_store %arg4[%c0_10, %c1, %c0_11], %16 {strides = array<i32>} : memref<1x2x128xf32, #tpu.memory_space<vmem>>, vector<1x1x128xf32>,
    return
  }
  func.func @transform_0(%arg0: i32) -> (i32, i32) {
    %c0_i32 = arith.constant 0 : i32
    %c0_i32_0 = arith.constant 0 : i32
    return %arg0, %c0_i32 : i32, i32
  }
  func.func @transform_1(%arg0: i32) -> (i32, i32) {
    %c0_i32 = arith.constant 0 : i32
    %c0_i32_0 = arith.constant 0 : i32
    %c0_i32_1 = arith.constant 0 : i32
    return %c0_i32, %c0_i32_0 : i32, i32
  }
  func.func @transform_2(%arg0: i32) -> (i32, i32) {
    %c0_i32 = arith.constant 0 : i32
    %c0_i32_0 = arith.constant 0 : i32
    return %arg0, %c0_i32 : i32, i32
  }
  func.func @transform_3(%arg0: i32) -> (i32, i32, i32) {
    %c0_i32 = arith.constant 0 : i32
    %c0_i32_0 = arith.constant 0 : i32
    %c0_i32_1 = arith.constant 0 : i32
    return %arg0, %c0_i32, %c0_i32_0 : i32, i32, i32
  }
}

module attributes {stable_mosaic.version = 11 : i64} {
  func.func @bn_silu_conv1x1_kernel(%arg0: i32, %arg1: memref<256x128xbf16, #tpu.memory_space<vmem>>, %arg2: memref<1x128xf32, #tpu.memory_space<vmem>>, %arg3: memref<1x128xf32, #tpu.memory_space<vmem>>, %arg4: memref<128x128xbf16, #tpu.memory_space<vmem>>, %arg5: memref<1x128xf32, #tpu.memory_space<vmem>>, %arg6: memref<256x128xbf16, #tpu.memory_space<vmem>>) attributes {dimension_semantics = [#tpu.dimension_semantics<parallel>], iteration_bounds = array<i64: 2>, scalar_prefetch = 0 : i64, scratch_operands = 0 : i64, tpu.core_type = #tpu.core_type<tc>, window_params = [{transform_indices = @transform_0, window_bounds = array<i64: 256, 128>}, {pipeline_mode = #tpu.pipeline_mode<synchronous>, transform_indices = @transform_1, window_bounds = array<i64: 1, 128>}, {pipeline_mode = #tpu.pipeline_mode<synchronous>, transform_indices = @transform_2, window_bounds = array<i64: 1, 128>}, {pipeline_mode = #tpu.pipeline_mode<synchronous>, transform_indices = @transform_3, window_bounds = array<i64: 128, 128>}, {pipeline_mode = #tpu.pipeline_mode<synchronous>, transform_indices = @transform_4, window_bounds = array<i64: 1, 128>}, {transform_indices = @transform_5, window_bounds = array<i64: 256, 128>}]} {
    %c0 = arith.constant 0 : index
    %c0_0 = arith.constant 0 : index
    %0 = vector.load %arg1[%c0, %c0_0] : memref<256x128xbf16, #tpu.memory_space<vmem>>, vector<256x128xbf16>
    %1 = arith.extf %0 : vector<256x128xbf16> to vector<256x128xf32>
    %c0_1 = arith.constant 0 : index
    %c0_2 = arith.constant 0 : index
    %2 = vector.load %arg2[%c0_1, %c0_2] : memref<1x128xf32, #tpu.memory_space<vmem>>, vector<1x128xf32>
    %3 = vector.broadcast %2 : vector<1x128xf32> to vector<256x128xf32>
    %4 = arith.mulf %1, %3 : vector<256x128xf32>
    %c0_3 = arith.constant 0 : index
    %c0_4 = arith.constant 0 : index
    %5 = vector.load %arg3[%c0_3, %c0_4] : memref<1x128xf32, #tpu.memory_space<vmem>>, vector<1x128xf32>
    %6 = vector.broadcast %5 : vector<1x128xf32> to vector<256x128xf32>
    %7 = arith.addf %4, %6 : vector<256x128xf32>
    %cst = arith.constant 0.000000e+00 : f32
    %8 = vector.broadcast %cst : f32 to vector<256x128xf32>
    %9 = arith.subf %8, %7 : vector<256x128xf32>
    %10 = math.exp %9 : vector<256x128xf32>
    %cst_5 = arith.constant 1.000000e+00 : f32
    %11 = vector.broadcast %cst_5 : f32 to vector<256x128xf32>
    %12 = arith.addf %11, %10 : vector<256x128xf32>
    %13 = tpu.reciprocal %12 {approx = true} : vector<256x128xf32> -> vector<256x128xf32>
    %14 = arith.mulf %7, %13 : vector<256x128xf32>
    %15 = arith.truncf %14 : vector<256x128xf32> to vector<256x128xbf16>
    %c0_6 = arith.constant 0 : index
    %c0_7 = arith.constant 0 : index
    %16 = vector.load %arg4[%c0_6, %c0_7] : memref<128x128xbf16, #tpu.memory_space<vmem>>, vector<128x128xbf16>
    %cst_8 = arith.constant dense<0.000000e+00> : vector<256x128xf32>
    %17 = tpu.matmul %15, %16, %cst_8 {dimension_numbers = #tpu.dot_dimension_numbers<[1], [0], [0], [1], [0, 0, 1, 1], [], []>} : vector<256x128xbf16>, vector<128x128xbf16>, vector<256x128xf32> -> vector<256x128xf32>
    %c0_9 = arith.constant 0 : index
    %c0_10 = arith.constant 0 : index
    %18 = vector.load %arg5[%c0_9, %c0_10] : memref<1x128xf32, #tpu.memory_space<vmem>>, vector<1x128xf32>
    %19 = vector.broadcast %18 : vector<1x128xf32> to vector<256x128xf32>
    %20 = arith.addf %17, %19 : vector<256x128xf32>
    %21 = arith.truncf %20 : vector<256x128xf32> to vector<256x128xbf16>
    %c0_11 = arith.constant 0 : index
    %c0_12 = arith.constant 0 : index
    %22 = vector.load %arg6[%c0_11, %c0_12] : memref<256x128xbf16, #tpu.memory_space<vmem>>, vector<256x128xbf16>
    tpu.vector_store %arg6[%c0_11, %c0_12], %21 {strides = array<i32>} : memref<256x128xbf16, #tpu.memory_space<vmem>>, vector<256x128xbf16>,
    return
  }
  func.func @transform_0(%arg0: i32) -> (i32, i32) {
    %c0_i32 = arith.constant 0 : i32
    %c0_i32_0 = arith.constant 0 : i32
    return %arg0, %c0_i32 : i32, i32
  }
  func.func @transform_1(%arg0: i32) -> (i32, i32) {
    %c0_i32 = arith.constant 0 : i32
    %c0_i32_0 = arith.constant 0 : i32
    %c0_i32_1 = arith.constant 0 : i32
    return %c0_i32, %c0_i32_0 : i32, i32
  }
  func.func @transform_2(%arg0: i32) -> (i32, i32) {
    %c0_i32 = arith.constant 0 : i32
    %c0_i32_0 = arith.constant 0 : i32
    %c0_i32_1 = arith.constant 0 : i32
    return %c0_i32, %c0_i32_0 : i32, i32
  }
  func.func @transform_3(%arg0: i32) -> (i32, i32) {
    %c0_i32 = arith.constant 0 : i32
    %c0_i32_0 = arith.constant 0 : i32
    %c0_i32_1 = arith.constant 0 : i32
    return %c0_i32, %c0_i32_0 : i32, i32
  }
  func.func @transform_4(%arg0: i32) -> (i32, i32) {
    %c0_i32 = arith.constant 0 : i32
    %c0_i32_0 = arith.constant 0 : i32
    %c0_i32_1 = arith.constant 0 : i32
    return %c0_i32, %c0_i32_0 : i32, i32
  }
  func.func @transform_5(%arg0: i32) -> (i32, i32) {
    %c0_i32 = arith.constant 0 : i32
    %c0_i32_0 = arith.constant 0 : i32
    return %arg0, %c0_i32 : i32, i32
  }
}

</mosaic_0001>

<bundles_post_ra>
// kernel: detect_forward.3
= control target key start
LH: loop header
LB: loop body
LE: loop exit
PB: predicated region body
PF: predicated region fallthrough
CT: control target
= control target key end

     0   :  { %s1557_s18 = smov 0   ;;  %s1889_s0 = inlined_call_operand.vmem [shape: bf16[512,128], index: 0, kind: input, shape index: {}]   ;;  %s1890_s1 = inlined_call_operand.vmem [shape: f32[1,128], index: 1, kind: input, shape index: {}]   ;;  %s1891_s2 = inlined_call_operand.vmem [shape: f32[1,128], index: 2, kind: input, shape index: {}]   ;;  %s1892_s3 = inlined_call_operand.vmem [shape: bf16[128,128], index: 3, kind: input, shape index: {}]   ;;  %s1893_s4 = inlined_call_operand.vmem [shape: f32[1,128], index: 4, kind: input, shape index: {}]   ;;  %s1894_s5 = inlined_call_operand.vmem [shape: bf16[512,128], index: 5, kind: output, shape index: {}]  }
   0x1 LB: > { %s1027_s19 = sadd.s32 4294967295, %s1525_s18   ;;  %p1031_p0 = scmp.ge.s32.totalorder %s1525_s18, 1  ;;  %s1525_s18 = sphi %s1557_s18, %s15_s18  }
   0x2   : > { %p188_p1 = scmp.lt.s32.totalorder %s1525_s18, 3 }
   0x4   : > { %p189_p2 = pnand %p1031_p0, %p188_p1 }
   0x5   : > { %s1032_s22 = sshll.u32 (!%p189_p2), %s1027_s19, 5 }
   0x6   : > { %192 = sbr.rel (%p189_p2) target bundleno = 326 (0x146), region = 40  ;;  %p217_p3 = scmp.lt.s32.totalorder (!%p189_p2), %s1032_s22, 63 }
   0xb   : > { %v1383_v0 = vld [vmem:[%s1892_s3 + $0x38] sm:$0xff]   ;;  %v1384_v1 = vld [vmem:[%s1892_s3 + $0x30] sm:$0xff]   ;;  %s1896_s22 = smov (!%p217_p3, %s1032_s22), 63  ;;  %v1385_v2 = vld [vmem:[%s1892_s3 + $0x28] sm:$0xff]  }
   0xc   : > { %1311 = vmatprep.subr.bf16.mxu0 %v1383_v0  ;;  %1359 = vmatprep.subr.bf16.mxu1 %v1383_v0  ;;  %s1033_s27 = sshll.u32 %s1896_s22, 2  ;;  %v1386_v3 = vld [vmem:[%s1892_s3 + $0x20] sm:$0xff]   ;;  %v1387_v21 = vld [vmem:[%s1892_s3 + $0x18] sm:$0xff]   ;;  %v1388_v38 = vld [vmem:[%s1892_s3 + $0x10] sm:$0xff]  }
   0xd   : > { %1312 = vmatpush3.bf16.msra.mxu0 %v1383_v0  ;;  %1367 = vmatpush3.bf16.msra.mxu1 %v1383_v0  ;;  %s1582_s30 = scalar_lea.vmem %s1889_s0, %s1033_s27  ;;  %v1591_v5 = vld [vmem:[%s1890_s1] ss:$0 sm:$0xff]  ;;  %v1389_v56 = vld [vmem:[%s1892_s3 + $0x8] sm:$0xff]   ;;  %s1839_s26 = scalar_lea.vmem %s1894_s5, %s1033_s27 }
   0xe   : > { %1313 = vmatprep.subr.bf16.mxu0 %v1384_v1  ;;  %1360 = vmatprep.subr.bf16.mxu1 %v1384_v1  ;;  %v1114_v4 = vld [vmem:[%s1582_s30] sm:$0xff]   ;;  %v1257_v9 = vld [vmem:[%s1582_s30 + $0x8] sm:$0xff]   ;;  %v1258_v16 = vld [vmem:[%s1582_s30 + $0x10] sm:$0xff]  }
   0xf   : > { %v1115_v6 = vunpack.c.l.bf16 %v1114_v4  ;;  %v1116_v7 = vunpack.c.h.bf16 %v1114_v4  ;;  %v1264_v8 = vld [vmem:[%s1582_s30 + $0x40] sm:$0xff]   ;;  %v1265_v10 = vld [vmem:[%s1582_s30 + $0x48] sm:$0xff]   ;;  %v1119_v14 = vunpack.c.l.bf16 %v1257_v9  ;;  %v1120_v15 = vunpack.c.h.bf16 %v1257_v9  ;;  %v1266_v43 = vld [vmem:[%s1582_s30 + $0x50] sm:$0xff]  }
  0x10   : > { %v1599_v11 = vld [vmem:[%s1891_s2] ss:$0 sm:$0xff]  ;;  %v1147_v12 = vunpack.c.l.bf16 %v1264_v8  ;;  %v1148_v13 = vunpack.c.h.bf16 %v1264_v8  ;;  %v1151_v19 = vunpack.c.l.bf16 %v1265_v10  ;;  %v1152_v20 = vunpack.c.h.bf16 %v1265_v10  ;;  %v1259_v44 = vld [vmem:[%s1582_s30 + $0x18] sm:$0xff]  }
  0x11   : > { %1314 = vmatpush3.bf16.msra.mxu0 %v1384_v1  ;;  %1368 = vmatpush3.bf16.msra.mxu1 %v1384_v1  ;;  %v300_v17 = vmul.f32 %v1115_v6, %v1591_v5  ;;  %v301_v18 = vmul.f32 %v1116_v7, %v1591_v5  ;;  %v302_v24 = vmul.f32 %v1119_v14, %v1591_v5  ;;  %v1123_v25 = vunpack.c.l.bf16 %v1258_v16  ;;  %v1390_v6 = vld [vmem:[%s1892_s3] sm:$0xff]   ;;  %v1267_v10 = vld [vmem:[%s1582_s30 + $0x58] sm:$0xff]  }
  0x12   : > { %1315 = vmatprep.subr.bf16.mxu0 %v1385_v2  ;;  %1361 = vmatprep.subr.bf16.mxu1 %v1385_v2  ;;  %v316_v22 = vmul.f32 %v1147_v12, %v1591_v5  ;;  %v317_v23 = vmul.f32 %v1148_v13, %v1591_v5  ;;  %v303_v28 = vmul.f32 %v1120_v15, %v1591_v5  ;;  %v1124_v52 = vunpack.c.h.bf16 %v1258_v16  ;;  %v1260_v15 = vld [vmem:[%s1582_s30 + $0x20] sm:$0xff]  }
  0x13   : > { %v1611_v26 = vadd.f32 %v1599_v11, %v300_v17  ;;  %v1614_v27 = vadd.f32 %v1599_v11, %v301_v18  ;;  %v318_v29 = vmul.f32 %v1151_v19, %v1591_v5  ;;  %v1625_v32 = vadd.f32 %v1599_v11, %v302_v24 }
  0x14   : > { %v1619_v30 = vadd.f32 %v1599_v11, %v316_v22  ;;  %v1622_v31 = vadd.f32 %v1599_v11, %v317_v23  ;;  %v319_v33 = vmul.f32 %v1152_v20, %v1591_v5  ;;  %v1631_v36 = vadd.f32 %v1599_v11, %v303_v28  ;;  %v1268_v28 = vld [vmem:[%s1582_s30 + $0x60] sm:$0xff]  }
  0x15   : > { %1316 = vmatpush3.bf16.msra.mxu0 %v1385_v2  ;;  %1369 = vmatpush3.bf16.msra.mxu1 %v1385_v2  ;;  %v371_v34 = vsub.f32 0.0, %v1611_v26  ;;  %v372_v35 = vsub.f32 0.0, %v1614_v27  ;;  %v1634_v37 = vadd.f32 %v1599_v11, %v318_v29  ;;  %v373_v41 = vsub.f32 0.0, %v1625_v32 }
  0x16   : > { %1317 = vmatprep.subr.bf16.mxu0 %v1386_v3  ;;  %1362 = vmatprep.subr.bf16.mxu1 %v1386_v3  ;;  %v387_v39 = vsub.f32 0.0, %v1619_v30  ;;  %v388_v40 = vsub.f32 0.0, %v1622_v31  ;;  %v1643_v42 = vadd.f32 %v1599_v11, %v319_v33  ;;  %v374_v47 = vsub.f32 0.0, %v1631_v36 }
  0x17   : > { %v403_v45 = vmul.f32 1.442695, %v371_v34  ;;  %v405_v46 = vmul.f32 1.442695, %v372_v35  ;;  %v389_v48 = vsub.f32 0.0, %v1634_v37  ;;  %v304_v57 = vmul.f32 %v1123_v25, %v1591_v5 }
  0x18   : > { %v435_v49 = vmul.f32 1.442695, %v387_v39  ;;  %v437_v50 = vmul.f32 1.442695, %v388_v40  ;;  %v407_v51 = vmul.f32 1.442695, %v373_v41  ;;  %v305_v58 = vmul.f32 %v1124_v52, %v1591_v5 }
  0x19   : > { %1318 = vmatpush3.bf16.msra.mxu0 %v1386_v3  ;;  %1370 = vmatpush3.bf16.msra.mxu1 %v1386_v3  ;;  %1391 = vpow2.f32 %v403_v45  ;;  %v409_v53 = vmul.f32 1.442695, %v374_v47  ;;  %v390_v54 = vsub.f32 0.0, %v1643_v42  ;;  %v439_v55 = vmul.f32 1.442695, %v389_v48 }
  0x1a   : > { %1319 = vmatprep.subr.bf16.mxu0 %v1387_v21  ;;  %1363 = vmatprep.subr.bf16.mxu1 %v1387_v21  ;;  %1393 = vpow2.f32 %v405_v46  ;;  %v1155_v59 = vunpack.c.l.bf16 %v1266_v43  ;;  %v1156_v61 = vunpack.c.h.bf16 %v1266_v43  ;;  %v1127_v62 = vunpack.c.l.bf16 %v1259_v44 }
  0x1b   : > { %1395 = vpow2.f32 %v435_v49  ;;  %v441_v60 = vmul.f32 1.442695, %v390_v54  ;;  %v1656_v63 = vadd.f32 %v1599_v11, %v304_v57  ;;  %v1659_v0 = vadd.f32 %v1599_v11, %v305_v58 }
  0x1c   : > { %1397 = vpow2.f32 %v437_v50  ;;  %v320_v1 = vmul.f32 %v1155_v59, %v1591_v5  ;;  %v321_v2 = vmul.f32 %v1156_v61, %v1591_v5  ;;  %v1128_v3 = vunpack.c.h.bf16 %v1259_v44 }
  0x1d   : > { %1320 = vmatpush3.bf16.msra.mxu0 %v1387_v21  ;;  %1371 = vmatpush3.bf16.msra.mxu1 %v1387_v21  ;;  %1399 = vpow2.f32 %v407_v51  ;;  %v306_v4 = vmul.f32 %v1127_v62, %v1591_v5  ;;  %v375_v7 = vsub.f32 0.0, %v1656_v63  ;;  %v376_v8 = vsub.f32 0.0, %v1659_v0 }
  0x1e   : > { %1321 = vmatprep.subr.bf16.mxu0 %v1388_v38  ;;  %1364 = vmatprep.subr.bf16.mxu1 %v1388_v38  ;;  %1401 = vpow2.f32 %v409_v53  ;;  %v1670_v9 = vadd.f32 %v1599_v11, %v320_v1  ;;  %v1674_v12 = vadd.f32 %v1599_v11, %v321_v2  ;;  %v307_v13 = vmul.f32 %v1128_v3, %v1591_v5  ;;  %v1261_v3 = vld [vmem:[%s1582_s30 + $0x28] sm:$0xff]  }
  0x1f   : > { %1403 = vpow2.f32 %v439_v55  ;;  %v1678_v14 = vadd.f32 %v1599_v11, %v306_v4  ;;  %v411_v16 = vmul.f32 1.442695, %v375_v7  ;;  %v413_v17 = vmul.f32 1.442695, %v376_v8 }
  0x20   : > { %1405 = vpow2.f32 %v441_v60  ;;  %v391_v18 = vsub.f32 0.0, %v1670_v9  ;;  %v392_v19 = vsub.f32 0.0, %v1674_v12  ;;  %v1684_v20 = vadd.f32 %v1599_v11, %v307_v13 }
  0x21   : > { %1322 = vmatpush3.bf16.msra.mxu0 %v1388_v38  ;;  %1372 = vmatpush3.bf16.msra.mxu1 %v1388_v38  ;;  %v377_v21 = vsub.f32 0.0, %v1678_v14  ;;  %v1159_v22 = vunpack.c.l.bf16 %v1267_v10  ;;  %1407 = vpow2.f32 %v411_v16  ;;  %v1160_v24 = vunpack.c.h.bf16 %v1267_v10 }
  0x22   : > { %1323 = vmatprep.subr.bf16.mxu0 %v1389_v56  ;;  %1365 = vmatprep.subr.bf16.mxu1 %v1389_v56  ;;  %v443_v23 = vmul.f32 1.442695, %v391_v18  ;;  %v1131_v25 = vunpack.c.l.bf16 %v1260_v15  ;;  %1409 = vpow2.f32 %v413_v17  ;;  %v445_v29 = vmul.f32 1.442695, %v392_v19  ;;  %v1269_v17 = vld [vmem:[%s1582_s30 + $0x68] sm:$0xff]  }
  0x23   : > { %v378_v33 = vsub.f32 0.0, %v1684_v20  ;;  %v415_v34 = vmul.f32 1.442695, %v377_v21  ;;  %v322_v35 = vmul.f32 %v1159_v22, %v1591_v5  ;;  %v323_v38 = vmul.f32 %v1160_v24, %v1591_v5 }
  0x24   : > { %1411 = vpow2.f32 %v443_v23  ;;  %v1132_v39 = vunpack.c.h.bf16 %v1260_v15  ;;  %v308_v41 = vmul.f32 %v1131_v25, %v1591_v5  ;;  %v1163_v43 = vunpack.c.l.bf16 %v1268_v28 }
  0x25   : > { %1324 = vmatpush3.bf16.msra.mxu0 %v1389_v56  ;;  %1373 = vmatpush3.bf16.msra.mxu1 %v1389_v56  ;;  %1413 = vpow2.f32 %v445_v29  ;;  %v417_v40 = vmul.f32 1.442695, %v378_v33  ;;  %v1693_v45 = vadd.f32 %v1599_v11, %v322_v35  ;;  %v1696_v46 = vadd.f32 %v1599_v11, %v323_v38 }
  0x26   : > { %1325 = vmatprep.subr.bf16.mxu0 %v1390_v6  ;;  %1366 = vmatprep.subr.bf16.mxu1 %v1390_v6  ;;  %v1392_v44 = vpop.eup %1391  ;;  %1415 = vpow2.f32 %v415_v34  ;;  %v309_v47 = vmul.f32 %v1132_v39, %v1591_v5  ;;  %v1700_v50 = vadd.f32 %v1599_v11, %v308_v41  ;;  %v1164_v51 = vunpack.c.h.bf16 %v1268_v28 }
  0x27   : > { %v1394_v48 = vpop.eup %1393  ;;  %v467_v49 = vadd.f32 1.0, %v1392_v44  ;;  %1417 = vpow2.f32 %v417_v40  ;;  %v393_v54 = vsub.f32 0.0, %v1693_v45  ;;  %v394_v55 = vsub.f32 0.0, %v1696_v46 }
  0x28   : > { %v1396_v52 = vpop.eup %1395  ;;  %v468_v53 = vadd.f32 1.0, %v1394_v48  ;;  %v1705_v56 = vadd.f32 %v1599_v11, %v309_v47  ;;  %v379_v59 = vsub.f32 0.0, %v1700_v50  ;;  %v324_v60 = vmul.f32 %v1163_v43, %v1591_v5 }
  0x29   : > { %1326 = vmatpush3.bf16.msra.mxu0 %v1390_v6  ;;  %1374 = vmatpush3.bf16.msra.mxu1 %v1390_v6  ;;  %v1398_v57 = vpop.eup %1397  ;;  %1419 = vrcp.f32 %v467_v49  ;;  %v483_v58 = vadd.f32 1.0, %v1396_v52  ;;  %v447_v1 = vmul.f32 1.442695, %v393_v54  ;;  %v1709_v2 = vmul.f32 1.442695, %v394_v55 }
  0x2a   : > { %v1400_v61 = vpop.eup %1399  ;;  %1421 = vrcp.f32 %v468_v53  ;;  %v484_v62 = vadd.f32 1.0, %v1398_v57  ;;  %v380_v7 = vsub.f32 0.0, %v1705_v56  ;;  %v1713_v8 = vmul.f32 1.442695, %v379_v59 }
  0x2b   : > { %v1402_v4 = vpop.eup %1401  ;;  %1423 = vrcp.f32 %v483_v58  ;;  %v469_v6 = vadd.f32 1.0, %v1400_v61  ;;  %v325_v15 = vmul.f32 %v1164_v51, %v1591_v5  ;;  %v1717_v16 = vadd.f32 %v1599_v11, %v324_v60  ;;  %v1262_v58 = vld [vmem:[%s1582_s30 + $0x30] sm:$0xff]  }
  0x2c   : > { %v1404_v10 = vpop.eup %1403  ;;  %1425 = vrcp.f32 %v484_v62  ;;  %v470_v13 = vadd.f32 1.0, %v1402_v4  ;;  %v1720_v21 = vmul.f32 1.442695, %v380_v7  ;;  %v1135_v22 = vunpack.c.l.bf16 %v1261_v3 }
  0x2d   : > { %v1406_v18 = vpop.eup %1405  ;;  %1427 = vrcp.f32 %v469_v6  ;;  %v485_v19 = vadd.f32 1.0, %v1404_v10  ;;  %v1723_v24 = vadd.f32 %v1599_v11, %v325_v15  ;;  %v395_v25 = vsub.f32 0.0, %v1717_v16 }
  0x2e   : > { %1429 = vrcp.f32 %v470_v13  ;;  %v486_v23 = vadd.f32 1.0, %v1406_v18  ;;  %v1408_v28 = vpop.eup %1407  ;;  %v1136_v29 = vunpack.c.h.bf16 %v1261_v3  ;;  %v310_v33 = vmul.f32 %v1135_v22, %v1591_v5 }
  0x2f   : > { %1431 = vrcp.f32 %v485_v19  ;;  %v1167_v34 = vunpack.c.l.bf16 %v1269_v17  ;;  %v1410_v35 = vpop.eup %1409  ;;  %v471_v38 = vadd.f32 1.0, %v1408_v28  ;;  %v396_v39 = vsub.f32 0.0, %v1723_v24 }
  0x30   : > { %1433 = vrcp.f32 %v486_v23  ;;  %v451_v40 = vmul.f32 1.442695, %v395_v25  ;;  %v472_v43 = vadd.f32 1.0, %v1410_v35  ;;  %v311_v44 = vmul.f32 %v1136_v29, %v1591_v5 }
  0x31   : > { %v1412_v41 = vpop.eup %1411  ;;  %1435 = vpow2.f32 %v447_v1  ;;  %v1730_v47 = vadd.f32 %v1599_v11, %v310_v33  ;;  %v453_v51 = vmul.f32 1.442695, %v396_v39  ;;  %v1168_v52 = vunpack.c.h.bf16 %v1269_v17 }
  0x32   : > { %v1414_v48 = vpop.eup %1413  ;;  %1437 = vrcp.f32 %v471_v38  ;;  %v487_v49 = vadd.f32 1.0, %v1412_v41  ;;  %v1733_v55 = vadd.f32 %v1599_v11, %v311_v44  ;;  %v326_v61 = vmul.f32 %v1167_v34, %v1591_v5 }
  0x33   : > { %v1416_v53 = vpop.eup %1415  ;;  %1439 = vrcp.f32 %v472_v43  ;;  %v488_v54 = vadd.f32 1.0, %v1414_v48  ;;  %v381_v57 = vsub.f32 0.0, %v1730_v47  ;;  %v327_v62 = vmul.f32 %v1168_v52, %v1591_v5 }
  0x34   : > { %v1418_v59 = vpop.eup %1417  ;;  %1441 = vrcp.f32 %v487_v49  ;;  %v473_v60 = vadd.f32 1.0, %v1416_v53  ;;  %v382_v3 = vsub.f32 0.0, %v1733_v55  ;;  %v1741_v7 = vadd.f32 %v1599_v11, %v326_v61  ;;  %v1263_v61 = vld [vmem:[%s1582_s30 + $0x38] sm:$0xff]  }
  0x35   : > { %1443 = vrcp.f32 %v488_v54  ;;  %v474_v1 = vadd.f32 1.0, %v1418_v59  ;;  %v423_v4 = vmul.f32 1.442695, %v381_v57  ;;  %v1744_v10 = vadd.f32 %v1599_v11, %v327_v62 }
  0x36   : > { %v1420_v6 = vpop.eup %1419  ;;  %1445 = vrcp.f32 %v473_v60  ;;  %v1139_v13 = vunpack.c.l.bf16 %v1262_v58  ;;  %v425_v18 = vmul.f32 1.442695, %v382_v3  ;;  %v1140_v19 = vunpack.c.h.bf16 %v1262_v58 }
  0x37   : > { %v1422_v15 = vpop.eup %1421  ;;  %v531_v17 = vmul.f32 %v1420_v6, %v1611_v26  ;;  %1447 = vrcp.f32 %v474_v1  ;;  %v397_v25 = vsub.f32 0.0, %v1741_v7  ;;  %v398_v28 = vsub.f32 0.0, %v1744_v10 }
  0x38   : > { %v1424_v22 = vpop.eup %1423  ;;  %v532_v23 = vmul.f32 %v1422_v15, %v1614_v27  ;;  %1449 = vpow2.f32 %v1709_v2  ;;  %v312_v26 = vmul.f32 %v1139_v13, %v1591_v5  ;;  %v313_v34 = vmul.f32 %v1140_v19, %v1591_v5  ;;  %v1270_v2 = vld [vmem:[%s1582_s30 + $0x70] sm:$0xff]   ;;  %v1271_v19 = vld [vmem:[%s1582_s30 + $0x78] sm:$0xff]  }
  0x39   : > { %v1426_v29 = vpop.eup %1425  ;;  %v547_v33 = vmul.f32 %v1424_v22, %v1619_v30  ;;  %1451 = vpow2.f32 %v1713_v8  ;;  %v455_v27 = vmul.f32 1.442695, %v397_v25  ;;  %v457_v44 = vmul.f32 1.442695, %v398_v28 }
  0x3a   : > { %v1428_v35 = vpop.eup %1427  ;;  %v563_v38 = vpack.c.bf16 %v532_v23, %v531_v17  ;;  %v548_v39 = vmul.f32 %v1426_v29, %v1622_v31  ;;  %1453 = vpow2.f32 %v1720_v21  ;;  %v1760_v30 = vadd.f32 %v1599_v11, %v312_v26 }
  0x3b   : > { %v1430_v41 = vpop.eup %1429  ;;  %v533_v43 = vmul.f32 %v1428_v35, %v1625_v32  ;;  %1455 = vpow2.f32 %v451_v40  ;;  %v1764_v31 = vadd.f32 %v1599_v11, %v313_v34  ;;  %v1171_v40 = vunpack.c.l.bf16 %v1270_v2 }
  0x3c   : > { %v1432_v8 = vpop.eup %1431  ;;  %1327 = vmatprep.mubr.bf16.mxu0 %v563_v38  ;;  %v571_v48 = vpack.c.bf16 %v548_v39, %v547_v33  ;;  %v534_v49 = vmul.f32 %v1430_v41, %v1631_v36  ;;  %1457 = vpow2.f32 %v453_v51  ;;  %v383_v32 = vsub.f32 0.0, %v1760_v30 }
  0x3d   : > { %v1434_v21 = vpop.eup %1433  ;;  %v549_v52 = vmul.f32 %v1432_v8, %v1634_v37  ;;  %1459 = vpow2.f32 %v423_v4  ;;  %v384_v36 = vsub.f32 0.0, %v1764_v31  ;;  %v1172_v60 = vunpack.c.h.bf16 %v1270_v2 }
  0x3e   : > { %v1436_v53 = vpop.eup %1435  ;;  %1343 = vmatprep.mubr.bf16.mxu1 %v571_v48  ;;  %v564_v54 = vpack.c.bf16 %v534_v49, %v533_v43  ;;  %v550_v57 = vmul.f32 %v1434_v21, %v1643_v42  ;;  %1461 = vpow2.f32 %v425_v18  ;;  %v427_v59 = vmul.f32 1.442695, %v383_v32 }
  0x3f   : > { %v1438_v51 = vpop.eup %1437  ;;  %v489_v58 = vadd.f32 1.0, %v1436_v53  ;;  %1463 = vpow2.f32 %v455_v27  ;;  %v429_v3 = vmul.f32 1.442695, %v384_v36  ;;  %v328_v6 = vmul.f32 %v1171_v40, %v1591_v5 }
  0x40   : > { %v1440_v37 = vpop.eup %1439  ;;  %1328 = vmatmul.mubr.bf16.vlgmr.msra.gmra.mxu0 %v564_v54  ;;  %v572_v62 = vpack.c.bf16 %v550_v57, %v549_v52  ;;  %v535_v1 = vmul.f32 %v1438_v51, %v1656_v63  ;;  %1465 = vpow2.f32 %v457_v44  ;;  %v1143_v17 = vunpack.c.l.bf16 %v1263_v61 }
  0x41   : > { %v1442_v4 = vpop.eup %1441  ;;  %v536_v42 = vmul.f32 %v1440_v37, %v1659_v0  ;;  %1467 = vpow2.f32 %v427_v59  ;;  %v1144_v18 = vunpack.c.h.bf16 %v1263_v61  ;;  %v329_v0 = vmul.f32 %v1172_v60, %v1591_v5 }
  0x42   : > { %v1444_v13 = vpop.eup %1443  ;;  %1344 = vmatmul.mubr.bf16.vlgmr.msra.gmra.mxu1 %v572_v62  ;;  %v551_v15 = vmul.f32 %v1442_v4, %v1670_v9  ;;  %1469 = vpow2.f32 %v429_v3  ;;  %v1780_v29 = vadd.f32 %v1599_v11, %v328_v6  ;;  %v314_v34 = vmul.f32 %v1143_v17, %v1591_v5 }
  0x43   : > { %v1446_v22 = vpop.eup %1445  ;;  %v565_v23 = vpack.c.bf16 %v536_v42, %v535_v1  ;;  %v552_v25 = vmul.f32 %v1444_v13, %v1674_v12  ;;  %1471 = vrcp.f32 %v489_v58  ;;  %v1175_v35 = vunpack.c.l.bf16 %v1271_v19 }
  0x44   : > { %v1448_v63 = vpop.eup %1447  ;;  %v537_v28 = vmul.f32 %v1446_v22, %v1678_v14  ;;  %v315_v39 = vmul.f32 %v1144_v18, %v1591_v5  ;;  %v1176_v41 = vunpack.c.h.bf16 %v1271_v19  ;;  %v1786_v8 = vadd.f32 %v1599_v11, %v329_v0 }
  0x45   : > { %v1450_v33 = vpop.eup %1449  ;;  %1331 = vmatprep.mubr.bf16.mxu0 %v565_v23  ;;  %v573_v9 = vpack.c.bf16 %v552_v25, %v551_v15  ;;  %v538_v26 = vmul.f32 %v1448_v63, %v1684_v20  ;;  %v399_v20 = vsub.f32 0.0, %v1780_v29  ;;  %v1790_v21 = vadd.f32 %v1599_v11, %v314_v34 }
  0x46   : > { %v1452_v38 = vpop.eup %1451  ;;  %v490_v12 = vadd.f32 1.0, %v1450_v33  ;;  %v330_v52 = vmul.f32 %v1175_v35, %v1591_v5  ;;  %v1794_v53 = vadd.f32 %v1599_v11, %v315_v39  ;;  %v331_v54 = vmul.f32 %v1176_v41, %v1591_v5 }
  0x47   : > { %v1454_v27 = vpop.eup %1453  ;;  %1347 = vmatprep.mubr.bf16.mxu1 %v573_v9  ;;  %v566_v14 = vpack.c.bf16 %v538_v26, %v537_v28  ;;  %v475_v2 = vadd.f32 1.0, %v1452_v38  ;;  %v400_v60 = vsub.f32 0.0, %v1786_v8  ;;  %v459_v1 = vmul.f32 1.442695, %v399_v20 }
  0x48   : > { %v1456_v43 = vpop.eup %1455  ;;  %1473 = vrcp.f32 %v490_v12  ;;  %v476_v44 = vadd.f32 1.0, %v1454_v27  ;;  %v1798_v51 = vadd.f32 %v1599_v11, %v330_v52  ;;  %v1802_v61 = vadd.f32 %v1599_v11, %v331_v54 }
  0x49   : > { %v1458_v48 = vpop.eup %1457  ;;  %1332 = vmatmul.mubr.bf16.gmra.mxu0 %v566_v14  ;;  %1475 = vrcp.f32 %v475_v2  ;;  %v491_v49 = vadd.f32 1.0, %v1456_v43  ;;  %v385_v5 = vsub.f32 0.0, %v1790_v21  ;;  %v386_v4 = vsub.f32 0.0, %v1794_v53 }
  0x4a   : > { %v1460_v32 = vpop.eup %1459  ;;  %1477 = vrcp.f32 %v476_v44  ;;  %v492_v40 = vadd.f32 1.0, %v1458_v48  ;;  %v401_v6 = vsub.f32 0.0, %v1798_v51  ;;  %v461_v17 = vmul.f32 1.442695, %v400_v60 }
  0x4b   : > { %v1462_v57 = vpop.eup %1461  ;;  %1479 = vrcp.f32 %v491_v49  ;;  %v477_v36 = vadd.f32 1.0, %v1460_v32  ;;  %v402_v11 = vsub.f32 0.0, %v1802_v61  ;;  %v431_v22 = vmul.f32 1.442695, %v385_v5 }
  0x4c   : > { %v1464_v58 = vpop.eup %1463  ;;  %1481 = vrcp.f32 %v492_v40  ;;  %v478_v59 = vadd.f32 1.0, %v1462_v57  ;;  %v433_v23 = vmul.f32 1.442695, %v386_v4  ;;  %v463_v25 = vmul.f32 1.442695, %v401_v6 }
  0x4d   : > { %v1466_v37 = vpop.eup %1465  ;;  %1483 = vrcp.f32 %v477_v36  ;;  %v493_v62 = vadd.f32 1.0, %v1464_v58  ;;  %v465_v28 = vmul.f32 1.442695, %v402_v11 }
  0x4e   : > { %1485 = vrcp.f32 %v478_v59  ;;  %v494_v3 = vadd.f32 1.0, %v1466_v37  ;;  %v1468_v42 = vpop.eup %1467 }
  0x4f   : > { %1487 = vrcp.f32 %v493_v62  ;;  %v1470_v13 = vpop.eup %1469  ;;  %v479_v15 = vadd.f32 1.0, %v1468_v42 }
  0x50   : > { %1489 = vrcp.f32 %v494_v3  ;;  %v1472_v18 = vpop.eup %1471  ;;  %v480_v19 = vadd.f32 1.0, %v1470_v13 }
  0x51   : > { %1491 = vpow2.f32 %v459_v1  ;;  %v553_v63 = vmul.f32 %v1472_v18, %v1693_v45 }
  0x52   : > { %1493 = vrcp.f32 %v479_v15 }
  0x53   : > { %1495 = vrcp.f32 %v480_v19 }
  0x54   : > { %1497 = vpow2.f32 %v461_v17 }
  0x55   : > { %v1474_v0 = vpop.eup %1473  ;;  %1499 = vpow2.f32 %v431_v22 }
  0x56   : > { %v1476_v33 = vpop.eup %1475  ;;  %v554_v9 = vmul.f32 %v1474_v0, %v1696_v46  ;;  %1501 = vpow2.f32 %v433_v23 }
  0x57   : > { %v1478_v26 = vpop.eup %1477  ;;  %v539_v34 = vmul.f32 %v1476_v33, %v1700_v50  ;;  %1503 = vpow2.f32 %v463_v25 }
  0x58   : > { %v1480_v35 = vpop.eup %1479  ;;  %v574_v38 = vpack.c.bf16 %v554_v9, %v553_v63  ;;  %v540_v12 = vmul.f32 %v1478_v26, %v1705_v56  ;;  %1505 = vpow2.f32 %v465_v28 }
  0x59   : > { %v1482_v39 = vpop.eup %1481  ;;  %v555_v45 = vmul.f32 %v1480_v35, %v1717_v16 }
  0x5a   : > { %v1484_v27 = vpop.eup %1483  ;;  %1348 = vmatmul.mubr.bf16.gmra.mxu1 %v574_v38  ;;  %v567_v14 = vpack.c.bf16 %v540_v12, %v539_v34  ;;  %v556_v2 = vmul.f32 %v1482_v39, %v1723_v24 }
  0x5b   : > { %v1486_v41 = vpop.eup %1485  ;;  %v541_v46 = vmul.f32 %v1484_v27, %v1730_v47 }
  0x5c   : > { %v1488_v43 = vpop.eup %1487  ;;  %1335 = vmatprep.mubr.bf16.mxu0 %v567_v14  ;;  %v575_v50 = vpack.c.bf16 %v556_v2, %v555_v45  ;;  %v542_v44 = vmul.f32 %v1486_v41, %v1733_v55 }
  0x5d   : > { %v1490_v20 = vpop.eup %1489  ;;  %v557_v56 = vmul.f32 %v1488_v43, %v1741_v7 }
  0x5e   : > { %v1492_v48 = vpop.eup %1491  ;;  %1351 = vmatprep.mubr.bf16.mxu1 %v575_v50  ;;  %v568_v49 = vpack.c.bf16 %v542_v44, %v541_v46  ;;  %v558_v16 = vmul.f32 %v1490_v20, %v1744_v10 }
  0x5f   : > { %v1494_v52 = vpop.eup %1493  ;;  %v495_v32 = vadd.f32 1.0, %v1492_v48 }
  0x60   : > { %v1496_v40 = vpop.eup %1495  ;;  %1336 = vmatmul.mubr.bf16.gmra.mxu0 %v568_v49  ;;  %v576_v24 = vpack.c.bf16 %v558_v16, %v557_v56  ;;  %v543_v47 = vmul.f32 %v1494_v52, %v1760_v30 }
  0x61   : > { %v1498_v54 = vpop.eup %1497  ;;  %v544_v57 = vmul.f32 %v1496_v40, %v1764_v31  ;;  %1507 = vrcp.f32 %v495_v32 }
  0x62   : > { %v1500_v55 = vpop.eup %1499  ;;  %1352 = vmatmul.mubr.bf16.gmra.mxu1 %v576_v24  ;;  %v496_v36 = vadd.f32 1.0, %v1498_v54 }
  0x63   : > { %v1502_v7 = vpop.eup %1501  ;;  %v569_v58 = vpack.c.bf16 %v544_v57, %v543_v47  ;;  %v481_v59 = vadd.f32 1.0, %v1500_v55 }
  0x64   : > { %v1504_v60 = vpop.eup %1503  ;;  %1509 = vrcp.f32 %v496_v36  ;;  %v482_v10 = vadd.f32 1.0, %v1502_v7 }
  0x65   : > { %v1506_v37 = vpop.eup %1505  ;;  %1339 = vmatprep.mubr.bf16.mxu0 %v569_v58  ;;  %1511 = vrcp.f32 %v481_v59  ;;  %v497_v62 = vadd.f32 1.0, %v1504_v60 }
  0x66   : > { %1513 = vrcp.f32 %v482_v10  ;;  %v498_v1 = vadd.f32 1.0, %v1506_v37 }
  0x67   : > { %1515 = vrcp.f32 %v497_v62 }
  0x68   : > { %1517 = vrcp.f32 %v498_v1 }
  0x6e   : > { %v1508_v30 = vpop.eup %1507 }
  0x6f   : > { %v559_v31 = vmul.f32 %v1508_v30, %v1780_v29 }
  0x71   : > { %v1510_v5 = vpop.eup %1509 }
  0x72   : > { %v1512_v3 = vpop.eup %1511  ;;  %v560_v4 = vmul.f32 %v1510_v5, %v1786_v8  ;;  %v1829_v8 = vld [vmem:[%s1893_s4] ss:$0 sm:$0xff] }
  0x73   : > { %v1514_v42 = vpop.eup %1513  ;;  %v545_v6 = vmul.f32 %v1512_v3, %v1790_v21 }
  0x74   : > { %v1516_v13 = vpop.eup %1515  ;;  %v577_v15 = vpack.c.bf16 %v560_v4, %v559_v31  ;;  %v546_v17 = vmul.f32 %v1514_v42, %v1794_v53 }
  0x75   : > { %v1518_v11 = vpop.eup %1517  ;;  %v561_v18 = vmul.f32 %v1516_v13, %v1798_v51 }
  0x76   : > { %1355 = vmatprep.mubr.bf16.mxu1 %v577_v15  ;;  %v570_v19 = vpack.c.bf16 %v546_v17, %v545_v6  ;;  %v562_v22 = vmul.f32 %v1518_v11, %v1802_v61 }
  0x78   : > { %1340 = vmatmul.mubr.bf16.gmra.mxu0 %v570_v19  ;;  %v578_v29 = vpack.c.bf16 %v562_v22, %v561_v18 }
  0x7a   : > { %1356 = vmatmul.mubr.bf16.gmra.mxu1 %v578_v29 }
 0x100   : > { %v1329_v23 = vpop.f32.mrf.mxu0 }
 0x101   : > { %v693_v51 = vadd.f32 %v1329_v23, %v1829_v8 }
 0x102   : > { %v1345_v21 = vpop.f32.mrf.mxu1  ;;  %v684_v25 = vpop.f32.mrf.mxu0 }
 0x103   : > { %v757_v0 = vadd.f32 %v1345_v21, %v1829_v8  ;;  %v685_v9 = vadd.f32 %v1829_v8, %v684_v25 }
 0x104   : > { %v748_v53 = vpop.f32.mrf.mxu1  ;;  %v1330_v63 = vpop.f32.mrf.mxu0 }
 0x105   : > { %v696_v28 = vadd.f32 %v1330_v63, %v1829_v8  ;;  %v749_v12 = vadd.f32 %v1829_v8, %v748_v53 }
 0x106   : > { %v1346_v61 = vpop.f32.mrf.mxu1  ;;  %v687_v33 = vpop.f32.mrf.mxu0 }
 0x107   : > { %v1185_v26 = vpack.c.bf16 %v696_v28, %v693_v51  ;;  %v760_v34 = vadd.f32 %v1346_v61, %v1829_v8  ;;  %v688_v35 = vadd.f32 %v1829_v8, %v687_v33 }
 0x108   : > { %v751_v38 = vpop.f32.mrf.mxu1 }
 0x109   : > { %1272 = vst [vmem:[%s1839_s26 + $0x8] sm:$0xff] %v1185_v26   ;;  %v1225_v39 = vpack.c.bf16 %v760_v34, %v757_v0  ;;  %v1180_v45 = vpack.c.bf16 %v688_v35, %v685_v9  ;;  %v752_v27 = vadd.f32 %v1829_v8, %v751_v38  ;;  %v1333_v14 = vpop.f32.mrf.mxu0 }
 0x10a   : > { %v709_v43 = vadd.f32 %v1333_v14, %v1829_v8 }
 0x10b   : > { %1280 = vst [vmem:[%s1839_s26 + $0x48] sm:$0xff] %v1225_v39   ;;  %1181 = vst [vmem:[%s1839_s26] sm:$0xff] %v1180_v45   ;;  %v1220_v2 = vpack.c.bf16 %v752_v27, %v749_v12  ;;  %v700_v41 = vpop.f32.mrf.mxu0 }
 0x10c   : > { %v701_v20 = vadd.f32 %v1829_v8, %v700_v41 }
 0x10d   : > { %1279 = vst [vmem:[%s1839_s26 + $0x40] sm:$0xff] %v1220_v2   ;;  %v1334_v46 = vpop.f32.mrf.mxu0 }
 0x10e   : > { %v712_v50 = vadd.f32 %v1334_v46, %v1829_v8 }
 0x10f   : > { %v703_v44 = vpop.f32.mrf.mxu0 }
 0x110   : > { %v1195_v56 = vpack.c.bf16 %v712_v50, %v709_v43  ;;  %v704_v48 = vadd.f32 %v1829_v8, %v703_v44 }
 0x112   : > { %1274 = vst [vmem:[%s1839_s26 + $0x18] sm:$0xff] %v1195_v56   ;;  %v1190_v49 = vpack.c.bf16 %v704_v48, %v701_v20 }
 0x114   : > { %1273 = vst [vmem:[%s1839_s26 + $0x10] sm:$0xff] %v1190_v49  }
 0x11a   : > { %v1349_v16 = vpop.f32.mrf.mxu1 }
 0x11b   : > { %v773_v40 = vadd.f32 %v1349_v16, %v1829_v8 }
 0x11c   : > { %v764_v52 = vpop.f32.mrf.mxu1 }
 0x11d   : > { %v765_v57 = vadd.f32 %v1829_v8, %v764_v52 }
 0x11e   : > { %v1350_v32 = vpop.f32.mrf.mxu1 }
 0x11f   : > { %v776_v24 = vadd.f32 %v1350_v32, %v1829_v8 }
 0x120   : > { %v767_v47 = vpop.f32.mrf.mxu1  ;;  %v1337_v54 = vpop.f32.mrf.mxu0 }
 0x121   : > { %v1235_v55 = vpack.c.bf16 %v776_v24, %v773_v40  ;;  %v768_v36 = vadd.f32 %v1829_v8, %v767_v47  ;;  %v725_v37 = vadd.f32 %v1337_v54, %v1829_v8 }
 0x122   : > { %v1353_v7 = vpop.f32.mrf.mxu1  ;;  %v716_v58 = vpop.f32.mrf.mxu0 }
 0x123   : > { %1282 = vst [vmem:[%s1839_s26 + $0x58] sm:$0xff] %v1235_v55   ;;  %v1230_v59 = vpack.c.bf16 %v768_v36, %v765_v57  ;;  %v789_v1 = vadd.f32 %v1353_v7, %v1829_v8  ;;  %v717_v5 = vadd.f32 %v1829_v8, %v716_v58 }
 0x124   : > { %v780_v60 = vpop.f32.mrf.mxu1  ;;  %v1338_v10 = vpop.f32.mrf.mxu0 }
 0x125   : > { %1281 = vst [vmem:[%s1839_s26 + $0x50] sm:$0xff] %v1230_v59   ;;  %v728_v62 = vadd.f32 %v1338_v10, %v1829_v8  ;;  %v781_v13 = vadd.f32 %v1829_v8, %v780_v60 }
 0x126   : > { %v1354_v30 = vpop.f32.mrf.mxu1  ;;  %v719_v31 = vpop.f32.mrf.mxu0 }
 0x127   : > { %v1205_v3 = vpack.c.bf16 %v728_v62, %v725_v37  ;;  %v792_v4 = vadd.f32 %v1354_v30, %v1829_v8  ;;  %v720_v42 = vadd.f32 %v1829_v8, %v719_v31 }
 0x128   : > { %v783_v6 = vpop.f32.mrf.mxu1 }
 0x129   : > { %1276 = vst [vmem:[%s1839_s26 + $0x28] sm:$0xff] %v1205_v3   ;;  %v1245_v15 = vpack.c.bf16 %v792_v4, %v789_v1  ;;  %v1200_v17 = vpack.c.bf16 %v720_v42, %v717_v5  ;;  %v784_v11 = vadd.f32 %v1829_v8, %v783_v6 }
 0x12b   : > { %1284 = vst [vmem:[%s1839_s26 + $0x68] sm:$0xff] %v1245_v15   ;;  %1275 = vst [vmem:[%s1839_s26 + $0x20] sm:$0xff] %v1200_v17   ;;  %v1240_v18 = vpack.c.bf16 %v784_v11, %v781_v13 }
 0x12d   : > { %1283 = vst [vmem:[%s1839_s26 + $0x60] sm:$0xff] %v1240_v18  }
 0x138   : > { %v1341_v19 = vpop.f32.mrf.mxu0 }
 0x139   : > { %v741_v25 = vadd.f32 %v1341_v19, %v1829_v8 }
 0x13a   : > { %v1357_v22 = vpop.f32.mrf.mxu1  ;;  %v732_v29 = vpop.f32.mrf.mxu0 }
 0x13b   : > { %v805_v63 = vadd.f32 %v1357_v22, %v1829_v8  ;;  %v733_v0 = vadd.f32 %v1829_v8, %v732_v29 }
 0x13c   : > { %v796_v23 = vpop.f32.mrf.mxu1  ;;  %v1342_v21 = vpop.f32.mrf.mxu0 }
 0x13d   : > { %v744_v53 = vadd.f32 %v1342_v21, %v1829_v8  ;;  %v797_v34 = vadd.f32 %v1829_v8, %v796_v23 }
 0x13e   : > { %v1358_v51 = vpop.f32.mrf.mxu1  ;;  %v735_v28 = vpop.f32.mrf.mxu0 }
 0x13f   : > { %v1215_v61 = vpack.c.bf16 %v744_v53, %v741_v25  ;;  %v808_v33 = vadd.f32 %v1358_v51, %v1829_v8  ;;  %v736_v9 = vadd.f32 %v1829_v8, %v735_v28 }
 0x140   : > { %v799_v26 = vpop.f32.mrf.mxu1 }
 0x141   : > { %1278 = vst [vmem:[%s1839_s26 + $0x38] sm:$0xff] %v1215_v61   ;;  %v1255_v35 = vpack.c.bf16 %v808_v33, %v805_v63  ;;  %v1210_v38 = vpack.c.bf16 %v736_v9, %v733_v0  ;;  %v800_v12 = vadd.f32 %v1829_v8, %v799_v26 }
 0x143   : > { %1286 = vst [vmem:[%s1839_s26 + $0x78] sm:$0xff] %v1255_v35   ;;  %1277 = vst [vmem:[%s1839_s26 + $0x30] sm:$0xff] %v1210_v38   ;;  %v1250_v39 = vpack.c.bf16 %v800_v12, %v797_v34 }
 0x145   : > { %1285 = vst [vmem:[%s1839_s26 + $0x70] sm:$0xff] %v1250_v39  }
 0x146 PF: > { %s15_s18 = sadd.s32 1, %s1525_s18  }
 0x147   : > { %p12_p4 = scmp.ge.s32.totalorder %s15_s18, 4  }
 0x149   :  { %14 = sbr.rel (!%p12_p4) target bundleno = 1 (0x1), region = 70 }

// kernel: detect_forward.2
= control target key start
LH: loop header
LB: loop body
LE: loop exit
PB: predicated region body
PF: predicated region fallthrough
CT: control target
= control target key end

     0   :  { %s1269_s12 = smov 0   ;;  %s1401_s0 = inlined_call_operand.vmem [shape: bf16[512,128], index: 0, kind: input, shape index: {}]   ;;  %s1402_s1 = inlined_call_operand.vmem [shape: bf16[128,128], index: 1, kind: input, shape index: {}]   ;;  %s1403_s2 = inlined_call_operand.vmem [shape: bf16[512,128], index: 2, kind: output, shape index: {0}]   ;;  %s1404_s3 = inlined_call_operand.vmem [shape: f32[2,2,128], index: 3, kind: output, shape index: {1}]  }
   0x1 LB: > { %s1275_s13 = sadd.s32 4294967295, %s1247_s12   ;;  %p930_p0 = scmp.ge.s32.totalorder %s1247_s12, 1  ;;  %s1247_s12 = sphi %s1269_s12, %s14_s12  }
   0x2   : > { %p141_p1 = scmp.lt.s32.totalorder %s1247_s12, 3 }
   0x4   : > { %p142_p2 = pnand %p930_p0, %p141_p1 }
   0x5   : > { %s931_s16 = sshll.u32 (!%p142_p2), %s1275_s13, 5  ;;  %p181_p4 = scmp.lt.s32.totalorder (!%p142_p2), %s1275_s13, 1 }
   0x6   : > { %145 = sbr.rel (%p142_p2) target bundleno = 326 (0x146), region = 28  ;;  %p170_p3 = scmp.lt.s32.totalorder (!%p142_p2), %s931_s16, 63 }
   0xb   : > { %v1217_v0 = vld [vmem:[%s1402_s1 + $0x38] sm:$0xff]   ;;  %v1218_v1 = vld [vmem:[%s1402_s1 + $0x30] sm:$0xff]   ;;  %s1406_s16 = smov (!%p170_p3, %s931_s16), 63  ;;  %v1219_v2 = vld [vmem:[%s1402_s1 + $0x28] sm:$0xff]   ;;  %s1408_s13 = smov (!%p181_p4, %s1275_s13), 1 }
   0xc   : > { %1145 = vmatprep.subr.bf16.mxu0 %v1217_v0  ;;  %1193 = vmatprep.subr.bf16.mxu1 %v1217_v0  ;;  %s932_s21 = sshll.u32 %s1406_s16, 2  ;;  %v1220_v3 = vld [vmem:[%s1402_s1 + $0x20] sm:$0xff]   ;;  %v1221_v5 = vld [vmem:[%s1402_s1 + $0x18] sm:$0xff]   ;;  %v1222_v6 = vld [vmem:[%s1402_s1 + $0x10] sm:$0xff]   ;;  %s935_s11 = sshll.u32 %s1408_s13, 1 }
   0xd   : > { %1146 = vmatpush3.bf16.msra.mxu0 %v1217_v0  ;;  %1201 = vmatpush3.bf16.msra.mxu1 %v1217_v0  ;;  %s1297_s24 = scalar_lea.vmem %s1401_s0, %s932_s21  ;;  %v1223_v8 = vld [vmem:[%s1402_s1 + $0x8] sm:$0xff]   ;;  %v1224_v9 = vld [vmem:[%s1402_s1] sm:$0xff]   ;;  %s1335_s10 = scalar_lea.vmem %s1403_s2, %s932_s21 }
   0xe   : > { %1147 = vmatprep.subr.bf16.mxu0 %v1218_v1  ;;  %1194 = vmatprep.subr.bf16.mxu1 %v1218_v1  ;;  %v1225_v4 = vld [vmem:[%s1297_s24] sm:$0xff]   ;;  %v1226_v10 = vld [vmem:[%s1297_s24 + $0x8] sm:$0xff]   ;;  %v1227_v12 = vld [vmem:[%s1297_s24 + $0x10] sm:$0xff]   ;;  %s184_s16 = scalar_lea.vmem %s1404_s3, %s935_s11 }
   0xf   : > { %1161 = vmatprep.mubr.bf16.mxu0 %v1225_v4  ;;  %v1233_v7 = vld [vmem:[%s1297_s24 + $0x40] sm:$0xff]   ;;  %v1234_v11 = vld [vmem:[%s1297_s24 + $0x48] sm:$0xff]   ;;  %v1235_v13 = vld [vmem:[%s1297_s24 + $0x50] sm:$0xff]  }
  0x10   : > { %1177 = vmatprep.mubr.bf16.mxu1 %v1233_v7  ;;  %v1228_v14 = vld [vmem:[%s1297_s24 + $0x18] sm:$0xff]   ;;  %v1229_v16 = vld [vmem:[%s1297_s24 + $0x20] sm:$0xff]   ;;  %v1230_v18 = vld [vmem:[%s1297_s24 + $0x28] sm:$0xff]  }
  0x11   : > { %1148 = vmatpush3.bf16.msra.mxu0 %v1218_v1  ;;  %1202 = vmatpush3.bf16.msra.mxu1 %v1218_v1  ;;  %v1236_v15 = vld [vmem:[%s1297_s24 + $0x58] sm:$0xff]   ;;  %v1237_v17 = vld [vmem:[%s1297_s24 + $0x60] sm:$0xff]   ;;  %v1238_v19 = vld [vmem:[%s1297_s24 + $0x68] sm:$0xff]  }
  0x12   : > { %1149 = vmatprep.subr.bf16.mxu0 %v1219_v2  ;;  %1195 = vmatprep.subr.bf16.mxu1 %v1219_v2  ;;  %v1231_v20 = vld [vmem:[%s1297_s24 + $0x30] sm:$0xff]   ;;  %v1232_v22 = vld [vmem:[%s1297_s24 + $0x38] sm:$0xff]  }
  0x13   : > { %v1239_v21 = vld [vmem:[%s1297_s24 + $0x70] sm:$0xff]   ;;  %v1240_v23 = vld [vmem:[%s1297_s24 + $0x78] sm:$0xff]  }
  0x15   : > { %1150 = vmatpush3.bf16.msra.mxu0 %v1219_v2  ;;  %1203 = vmatpush3.bf16.msra.mxu1 %v1219_v2 }
  0x16   : > { %1151 = vmatprep.subr.bf16.mxu0 %v1220_v3  ;;  %1196 = vmatprep.subr.bf16.mxu1 %v1220_v3 }
  0x19   : > { %1152 = vmatpush3.bf16.msra.mxu0 %v1220_v3  ;;  %1204 = vmatpush3.bf16.msra.mxu1 %v1220_v3 }
  0x1a   : > { %1153 = vmatprep.subr.bf16.mxu0 %v1221_v5  ;;  %1197 = vmatprep.subr.bf16.mxu1 %v1221_v5 }
  0x1d   : > { %1154 = vmatpush3.bf16.msra.mxu0 %v1221_v5  ;;  %1205 = vmatpush3.bf16.msra.mxu1 %v1221_v5 }
  0x1e   : > { %1155 = vmatprep.subr.bf16.mxu0 %v1222_v6  ;;  %1198 = vmatprep.subr.bf16.mxu1 %v1222_v6 }
  0x21   : > { %1156 = vmatpush3.bf16.msra.mxu0 %v1222_v6  ;;  %1206 = vmatpush3.bf16.msra.mxu1 %v1222_v6 }
  0x22   : > { %1157 = vmatprep.subr.bf16.mxu0 %v1223_v8  ;;  %1199 = vmatprep.subr.bf16.mxu1 %v1223_v8 }
  0x25   : > { %1158 = vmatpush3.bf16.msra.mxu0 %v1223_v8  ;;  %1207 = vmatpush3.bf16.msra.mxu1 %v1223_v8 }
  0x26   : > { %1159 = vmatprep.subr.bf16.mxu0 %v1224_v9  ;;  %1200 = vmatprep.subr.bf16.mxu1 %v1224_v9 }
  0x29   : > { %1160 = vmatpush3.bf16.msra.mxu0 %v1224_v9  ;;  %1208 = vmatpush3.bf16.msra.mxu1 %v1224_v9 }
  0x2c   : > { %1162 = vmatmul.mubr.bf16.vlgmr.msra.gmra.mxu0 %v1226_v10  ;;  %1178 = vmatmul.mubr.bf16.vlgmr.msra.gmra.mxu1 %v1234_v11 }
  0x2d   : > { %1165 = vmatprep.mubr.bf16.mxu0 %v1227_v12  ;;  %1181 = vmatprep.mubr.bf16.mxu1 %v1235_v13 }
  0x34   : > { %1166 = vmatmul.mubr.bf16.gmra.mxu0 %v1228_v14  ;;  %1182 = vmatmul.mubr.bf16.gmra.mxu1 %v1236_v15 }
  0x35   : > { %1169 = vmatprep.mubr.bf16.mxu0 %v1229_v16  ;;  %1185 = vmatprep.mubr.bf16.mxu1 %v1237_v17 }
  0x3c   : > { %1170 = vmatmul.mubr.bf16.gmra.mxu0 %v1230_v18  ;;  %1186 = vmatmul.mubr.bf16.gmra.mxu1 %v1238_v19 }
  0x3d   : > { %1173 = vmatprep.mubr.bf16.mxu0 %v1231_v20  ;;  %1189 = vmatprep.mubr.bf16.mxu1 %v1239_v21 }
  0x44   : > { %1174 = vmatmul.mubr.bf16.gmra.mxu0 %v1232_v22  ;;  %1190 = vmatmul.mubr.bf16.gmra.mxu1 %v1240_v23 }
  0xec   : > { %v1163_v24 = vpop.f32.mrf.mxu0  ;;  %v1179_v25 = vpop.f32.mrf.mxu1 }
  0xee   : > { %v412_v26 = vpop.f32.mrf.mxu0  ;;  %v476_v27 = vpop.f32.mrf.mxu1 }
  0xf0   : > { %v1164_v28 = vpop.f32.mrf.mxu0  ;;  %v1180_v29 = vpop.f32.mrf.mxu1 }
  0xf1   : > { %v540_v30 = vpack.c.bf16 %v1164_v28, %v1163_v24  ;;  %v1337_v31 = vpack.c.bf16 %v1180_v29, %v1179_v25 }
  0xf2   : > { %v415_v32 = vpop.f32.mrf.mxu0  ;;  %v479_v33 = vpop.f32.mrf.mxu1 }
  0xf3   : > { %1106 = vst [vmem:[%s1335_s10 + $0x8] sm:$0xff] %v540_v30   ;;  %v539_v34 = vpack.c.bf16 %v415_v32, %v412_v26  ;;  %1114 = vst [vmem:[%s1335_s10 + $0x48] sm:$0xff] %v1337_v31   ;;  %v701_v35 = vunpack.c.l.bf16 %v540_v30  ;;  %v1342_v37 = vpack.c.bf16 %v479_v33, %v476_v27  ;;  %v702_v46 = vunpack.c.h.bf16 %v540_v30 }
  0xf4   : > { %v1167_v36 = vpop.f32.mrf.mxu0  ;;  %v1183_v38 = vpop.f32.mrf.mxu1 }
  0xf5   : > { %1030 = vst [vmem:[%s1335_s10] sm:$0xff] %v539_v34   ;;  %v699_v39 = vunpack.c.l.bf16 %v539_v34  ;;  %v700_v40 = vunpack.c.h.bf16 %v539_v34  ;;  %1113 = vst [vmem:[%s1335_s10 + $0x40] sm:$0xff] %v1342_v37   ;;  %v771_v47 = vmul.f32 %v701_v35, %v701_v35  ;;  %v772_v61 = vmul.f32 %v702_v46, %v702_v46 }
  0xf6   : > { %v428_v41 = vpop.f32.mrf.mxu0  ;;  %v492_v42 = vpop.f32.mrf.mxu1 }
  0xf7   : > { %v731_v43 = vadd.f32 %v700_v40, %v699_v39  ;;  %v769_v44 = vmul.f32 %v699_v39, %v699_v39  ;;  %v770_v45 = vmul.f32 %v700_v40, %v700_v40 }
  0xf8   : > { %v1168_v48 = vpop.f32.mrf.mxu0  ;;  %v1184_v49 = vpop.f32.mrf.mxu1 }
  0xf9   : > { %v732_v50 = vadd.f32 %v731_v43, %v701_v35  ;;  %v801_v51 = vadd.f32 %v770_v45, %v769_v44  ;;  %v542_v52 = vpack.c.bf16 %v1168_v48, %v1167_v36  ;;  %v1347_v53 = vpack.c.bf16 %v1184_v49, %v1183_v38 }
  0xfa   : > { %v431_v54 = vpop.f32.mrf.mxu0  ;;  %v495_v55 = vpop.f32.mrf.mxu1 }
  0xfb   : > { %v802_v56 = vadd.f32 %v801_v51, %v771_v47  ;;  %1108 = vst [vmem:[%s1335_s10 + $0x18] sm:$0xff] %v542_v52   ;;  %v541_v57 = vpack.c.bf16 %v431_v54, %v428_v41  ;;  %1116 = vst [vmem:[%s1335_s10 + $0x58] sm:$0xff] %v1347_v53   ;;  %v1352_v59 = vpack.c.bf16 %v495_v55, %v492_v42  ;;  %v705_v3 = vunpack.c.l.bf16 %v542_v52 }
  0xfc   : > { %v1171_v58 = vpop.f32.mrf.mxu0  ;;  %v1187_v60 = vpop.f32.mrf.mxu1  ;;  %v733_v0 = vadd.f32 %v732_v50, %v702_v46  ;;  %v706_v7 = vunpack.c.h.bf16 %v542_v52 }
  0xfd   : > { %1107 = vst [vmem:[%s1335_s10 + $0x10] sm:$0xff] %v541_v57   ;;  %v703_v62 = vunpack.c.l.bf16 %v541_v57  ;;  %v704_v63 = vunpack.c.h.bf16 %v541_v57  ;;  %1115 = vst [vmem:[%s1335_s10 + $0x50] sm:$0xff] %v1352_v59   ;;  %v803_v6 = vadd.f32 %v802_v56, %v772_v61  ;;  %v775_v17 = vmul.f32 %v705_v3, %v705_v3 }
  0xfe   : > { %v444_v1 = vpop.f32.mrf.mxu0  ;;  %v508_v2 = vpop.f32.mrf.mxu1  ;;  %v776_v24 = vmul.f32 %v706_v7, %v706_v7 }
  0xff   : > { %v734_v4 = vadd.f32 %v733_v0, %v703_v62  ;;  %v773_v5 = vmul.f32 %v703_v62, %v703_v62  ;;  %v774_v11 = vmul.f32 %v704_v63, %v704_v63 }
 0x100   : > { %v1172_v8 = vpop.f32.mrf.mxu0  ;;  %v1188_v9 = vpop.f32.mrf.mxu1 }
 0x101   : > { %v735_v10 = vadd.f32 %v734_v4, %v704_v63  ;;  %v804_v12 = vadd.f32 %v803_v6, %v773_v5  ;;  %v544_v13 = vpack.c.bf16 %v1172_v8, %v1171_v58  ;;  %v1357_v15 = vpack.c.bf16 %v1188_v9, %v1187_v60 }
 0x102   : > { %v447_v14 = vpop.f32.mrf.mxu0  ;;  %v511_v16 = vpop.f32.mrf.mxu1  ;;  %v715_v6 = vunpack.c.l.bf16 %v1342_v37  ;;  %v716_v9 = vunpack.c.h.bf16 %v1342_v37  ;;  %v720_v37 = vunpack.c.h.bf16 %v1352_v59 }
 0x103   : > { %v736_v18 = vadd.f32 %v735_v10, %v705_v3  ;;  %v805_v19 = vadd.f32 %v804_v12, %v774_v11  ;;  %1110 = vst [vmem:[%s1335_s10 + $0x28] sm:$0xff] %v544_v13   ;;  %v543_v20 = vpack.c.bf16 %v447_v14, %v444_v1  ;;  %1118 = vst [vmem:[%s1335_s10 + $0x68] sm:$0xff] %v1357_v15   ;;  %v709_v33 = vunpack.c.l.bf16 %v544_v13 }
 0x104   : > { %v1175_v21 = vpop.f32.mrf.mxu0  ;;  %v1362_v22 = vpack.c.bf16 %v511_v16, %v508_v2  ;;  %v1191_v23 = vpop.f32.mrf.mxu1  ;;  %v710_v41 = vunpack.c.h.bf16 %v544_v13  ;;  %v717_v11 = vunpack.c.l.bf16 %v1337_v31  ;;  %v785_v13 = vmul.f32 %v715_v6, %v715_v6 }
 0x105   : > { %v806_v25 = vadd.f32 %v805_v19, %v775_v17  ;;  %v737_v26 = vadd.f32 %v736_v18, %v706_v7  ;;  %1109 = vst [vmem:[%s1335_s10 + $0x20] sm:$0xff] %v543_v20   ;;  %v707_v27 = vunpack.c.l.bf16 %v543_v20  ;;  %v708_v28 = vunpack.c.h.bf16 %v543_v20 }
 0x106   : > { %v460_v29 = vpop.f32.mrf.mxu0  ;;  %1117 = vst [vmem:[%s1335_s10 + $0x60] sm:$0xff] %v1362_v22   ;;  %v524_v30 = vpop.f32.mrf.mxu1  ;;  %v779_v48 = vmul.f32 %v709_v33, %v709_v33  ;;  %v780_v54 = vmul.f32 %v710_v41, %v710_v41  ;;  %v718_v16 = vunpack.c.h.bf16 %v1337_v31  ;;  %v786_v18 = vmul.f32 %v716_v9, %v716_v9 }
 0x107   : > { %v807_v32 = vadd.f32 %v806_v25, %v776_v24  ;;  %v738_v34 = vadd.f32 %v737_v26, %v707_v27  ;;  %v777_v35 = vmul.f32 %v707_v27, %v707_v27  ;;  %v778_v43 = vmul.f32 %v708_v28, %v708_v28 }
 0x108   : > { %v1176_v36 = vpop.f32.mrf.mxu0  ;;  %v1192_v38 = vpop.f32.mrf.mxu1  ;;  %v787_v20 = vmul.f32 %v717_v11, %v717_v11  ;;  %v719_v24 = vunpack.c.l.bf16 %v1352_v59  ;;  %v788_v25 = vmul.f32 %v718_v16, %v718_v16  ;;  %v722_v31 = vunpack.c.h.bf16 %v1347_v53 }
 0x109   : > { %v546_v39 = vpack.c.bf16 %v1176_v36, %v1175_v21  ;;  %v1367_v40 = vpack.c.bf16 %v1192_v38, %v1191_v23  ;;  %v739_v42 = vadd.f32 %v738_v34, %v708_v28  ;;  %v808_v44 = vadd.f32 %v807_v32, %v777_v35 }
 0x10a   : > { %v463_v45 = vpop.f32.mrf.mxu0  ;;  %v527_v46 = vpop.f32.mrf.mxu1  ;;  %v721_v28 = vunpack.c.l.bf16 %v1347_v53  ;;  %v790_v34 = vmul.f32 %v720_v37, %v720_v37  ;;  %v724_v59 = vunpack.c.h.bf16 %v1362_v22  ;;  %v726_v53 = vunpack.c.h.bf16 %v1357_v15 }
 0x10b   : > { %1112 = vst [vmem:[%s1335_s10 + $0x38] sm:$0xff] %v546_v39   ;;  %v545_v47 = vpack.c.bf16 %v463_v45, %v460_v29  ;;  %1120 = vst [vmem:[%s1335_s10 + $0x78] sm:$0xff] %v1367_v40   ;;  %v740_v49 = vadd.f32 %v739_v42, %v709_v33  ;;  %v809_v50 = vadd.f32 %v808_v44, %v778_v43  ;;  %v713_v60 = vunpack.c.l.bf16 %v546_v39 }
 0x10c   : > { %v1372_v51 = vpack.c.bf16 %v527_v46, %v524_v30  ;;  %v714_v63 = vunpack.c.h.bf16 %v546_v39  ;;  %v789_v30 = vmul.f32 %v719_v24, %v719_v24  ;;  %v791_v36 = vmul.f32 %v721_v28, %v721_v28 }
 0x10d   : > { %1111 = vst [vmem:[%s1335_s10 + $0x30] sm:$0xff] %v545_v47   ;;  %v711_v52 = vunpack.c.l.bf16 %v545_v47  ;;  %v810_v55 = vadd.f32 %v809_v50, %v779_v48  ;;  %v712_v56 = vunpack.c.h.bf16 %v545_v47  ;;  %v741_v57 = vadd.f32 %v740_v49, %v710_v41 }
 0x10e   : > { %1119 = vst [vmem:[%s1335_s10 + $0x70] sm:$0xff] %v1372_v51   ;;  %v783_v3 = vmul.f32 %v713_v60, %v713_v60  ;;  %v784_v7 = vmul.f32 %v714_v63, %v714_v63  ;;  %v723_v41 = vunpack.c.l.bf16 %v1362_v22  ;;  %v792_v42 = vmul.f32 %v722_v31, %v722_v31 }
 0x10f   : > { %v781_v58 = vmul.f32 %v711_v52, %v711_v52  ;;  %v742_v61 = vadd.f32 %v741_v57, %v711_v52  ;;  %v811_v62 = vadd.f32 %v810_v55, %v780_v54  ;;  %v782_v1 = vmul.f32 %v712_v56, %v712_v56 }
 0x110   : > { %v725_v45 = vunpack.c.l.bf16 %v1357_v15  ;;  %v793_v47 = vmul.f32 %v723_v41, %v723_v41  ;;  %v794_v50 = vmul.f32 %v724_v59, %v724_v59  ;;  %v727_v57 = vunpack.c.l.bf16 %v1372_v51 }
 0x111   : > { %v743_v0 = vadd.f32 %v742_v61, %v712_v56  ;;  %v812_v2 = vadd.f32 %v811_v62, %v781_v58  ;;  %v796_v58 = vmul.f32 %v726_v53, %v726_v53  ;;  %v728_v22 = vunpack.c.h.bf16 %v1372_v51 }
 0x112   : > { %v795_v54 = vmul.f32 %v725_v45, %v725_v45  ;;  %v729_v62 = vunpack.c.l.bf16 %v1367_v40 }
 0x113   : > { %v744_v4 = vadd.f32 %v743_v0, %v713_v60  ;;  %v813_v5 = vadd.f32 %v812_v2, %v782_v1  ;;  %v797_v0 = vmul.f32 %v727_v57, %v727_v57  ;;  %v730_v1 = vunpack.c.h.bf16 %v1367_v40 }
 0x115   : > { %v814_v8 = vadd.f32 %v813_v5, %v783_v3  ;;  %v745_v10 = vadd.f32 %v744_v4, %v714_v63  ;;  %v798_v3 = vmul.f32 %v728_v22, %v728_v22  ;;  %v799_v5 = vmul.f32 %v729_v62, %v729_v62 }
 0x117   : > { %v746_v12 = vadd.f32 %v745_v10, %v715_v6  ;;  %v815_v14 = vadd.f32 %v814_v8, %v784_v7  ;;  %v800_v8 = vmul.f32 %v730_v1, %v730_v1 }
 0x119   : > { %v747_v17 = vadd.f32 %v746_v12, %v716_v9  ;;  %v816_v19 = vadd.f32 %v815_v14, %v785_v13 }
 0x11b   : > { %v748_v21 = vadd.f32 %v747_v17, %v717_v11  ;;  %v817_v23 = vadd.f32 %v816_v19, %v786_v18 }
 0x11d   : > { %v818_v26 = vadd.f32 %v817_v23, %v787_v20  ;;  %v749_v27 = vadd.f32 %v748_v21, %v718_v16 }
 0x11f   : > { %v750_v29 = vadd.f32 %v749_v27, %v719_v24  ;;  %v819_v32 = vadd.f32 %v818_v26, %v788_v25 }
 0x121   : > { %v751_v33 = vadd.f32 %v750_v29, %v720_v37  ;;  %v820_v35 = vadd.f32 %v819_v32, %v789_v30 }
 0x123   : > { %v752_v38 = vadd.f32 %v751_v33, %v721_v28  ;;  %v821_v39 = vadd.f32 %v820_v35, %v790_v34 }
 0x125   : > { %v822_v43 = vadd.f32 %v821_v39, %v791_v36  ;;  %v753_v44 = vadd.f32 %v752_v38, %v722_v31 }
 0x127   : > { %v754_v46 = vadd.f32 %v753_v44, %v723_v41  ;;  %v823_v48 = vadd.f32 %v822_v43, %v792_v42 }
 0x129   : > { %v755_v49 = vadd.f32 %v754_v46, %v724_v59  ;;  %v824_v52 = vadd.f32 %v823_v48, %v793_v47 }
 0x12b   : > { %v756_v55 = vadd.f32 %v755_v49, %v725_v45  ;;  %v825_v56 = vadd.f32 %v824_v52, %v794_v50 }
 0x12d   : > { %v826_v60 = vadd.f32 %v825_v56, %v795_v54  ;;  %v757_v61 = vadd.f32 %v756_v55, %v726_v53 }
 0x12f   : > { %v758_v63 = vadd.f32 %v757_v61, %v727_v57  ;;  %v827_v15 = vadd.f32 %v826_v60, %v796_v58 }
 0x131   : > { %v759_v2 = vadd.f32 %v758_v63, %v728_v22  ;;  %v828_v4 = vadd.f32 %v827_v15, %v797_v0 }
 0x133   : > { %v760_v6 = vadd.f32 %v759_v2, %v729_v62  ;;  %v829_v7 = vadd.f32 %v828_v4, %v798_v3 }
 0x135   : > { %v761_v9 = vadd.f32 %v760_v6, %v730_v1  ;;  %v830_v10 = vadd.f32 %v829_v7, %v799_v5 }
 0x137   : > { %v762_v51 = vrot.slane %v761_v9, 4  ;;  %v831_v11 = vadd.f32 %v830_v10, %v800_v8 }
 0x139   : > { %v763_v12 = vadd.f32 %v762_v51, %v761_v9  ;;  %v832_v13 = vrot.slane %v831_v11, 4 }
 0x13b   : > { %v764_v14 = vrot.slane %v763_v12, 2  ;;  %v833_v16 = vadd.f32 %v832_v13, %v831_v11 }
 0x13d   : > { %v765_v17 = vadd.f32 %v764_v14, %v763_v12  ;;  %v834_v40 = vrot.slane %v833_v16, 2 }
 0x13f   : > { %v766_v18 = vrot.slane %v765_v17, 1  ;;  %v835_v19 = vadd.f32 %v834_v40, %v833_v16 }
 0x141   : > { %v767_v20 = vadd.f32 %v766_v18, %v765_v17  ;;  %v836_v21 = vrot.slane %v835_v19, 1 }
 0x143   : > { %768 = vst [vmem:[%s184_s16] sm:$0x1] %v767_v20  ;;  %v837_v23 = vadd.f32 %v836_v21, %v835_v19 }
 0x145   : > { %838 = vst [vmem:[%s184_s16 + $0x1] sm:$0x1] %v837_v23 }
 0x146 PF: > { %s14_s12 = sadd.s32 1, %s1247_s12  }
 0x147   : > { %p11_p5 = scmp.ge.s32.totalorder %s14_s12, 4  }
 0x149   :  { %13 = sbr.rel (!%p11_p5) target bundleno = 1 (0x1), region = 70 }

</bundles_post_ra>
